<compile_context>
chip_gen: v6e
topology: v6e:2x2x1
jax: 0.10.0
libtpu: 0.0.40
codegen_flags: <defaults>
</compile_context>

<pallas_src>
import functools
import math

import jax
import jax.numpy as jnp
from jax import lax
from jax.experimental import pallas as pl
from jax.experimental.pallas import tpu as pltpu


def _round_up(x, m):
    return ((x + m - 1) // m) * m


# ---------------------------------------------------------------------------
# Linear kernel: y = x @ W + b   (row-tiled, weights resident across the grid)
# ---------------------------------------------------------------------------
def linear_kernel(x_ref, w_ref, b_ref, o_ref):
    y = jnp.dot(x_ref[...], w_ref[...], preferred_element_type=jnp.float32)
    o_ref[...] = (y + b_ref[...]).astype(o_ref.dtype)


def linear(x2d, w, b, *, tm=256):
    """x2d: (M, K). w: (K, N). b: (N,). Returns (M, N)."""
    M, K = x2d.shape
    N = w.shape[1]
    # Large row tile for MXU utilisation, but never bigger than the
    # sublane-rounded problem; pad rows up instead of asserting divisibility.
    tm = min(tm, _round_up(M, 8))
    Mp = _round_up(M, tm)
    if Mp != M:
        x2d = jnp.pad(x2d, ((0, Mp - M), (0, 0)))
    b2d = b.reshape(1, N)

    itemsize = jnp.dtype(x2d.dtype).itemsize
    cost = pl.CostEstimate(
        flops=2 * Mp * K * N,
        transcendentals=0,
        bytes_accessed=(Mp * K + K * N + N + Mp * N) * itemsize,
    )

    out = pl.pallas_call(
        linear_kernel,
        out_shape=jax.ShapeDtypeStruct((Mp, N), x2d.dtype),
        grid_spec=pltpu.PrefetchScalarGridSpec(
            num_scalar_prefetch=0,
            grid=(Mp // tm,),
            in_specs=[
                pl.BlockSpec((tm, K), lambda i: (i, 0)),   # activation rows stream
                pl.BlockSpec((K, N), lambda i: (0, 0)),    # weights resident
                pl.BlockSpec((1, N), lambda i: (0, 0)),    # bias resident
            ],
            out_specs=pl.BlockSpec((tm, N), lambda i: (i, 0)),
        ),
        compiler_params=pltpu.CompilerParams(
            dimension_semantics=("parallel",)),
        cost_estimate=cost,
    )(x2d, w, b2d)
    return out[:M]


# ---------------------------------------------------------------------------
# Attention core: per (batch*head) block, scores -> mask -> softmax -> alpha@V
# ---------------------------------------------------------------------------
def attn_kernel(q_ref, k_ref, v_ref, m_ref, ctx_ref, alpha_ref, *, scale):
    q = q_ref[0].astype(jnp.float32)        # (Sq, Dh)
    k = k_ref[0].astype(jnp.float32)        # (Sk, Dh)
    v = v_ref[0].astype(jnp.float32)        # (Sk, Dh)

    # scores = Q K^T / sqrt(Dh): contract head_dim of both operands on the MXU.
    s = lax.dot_general(q, k, (((1,), (1,)), ((), ())),
                        preferred_element_type=jnp.float32) * scale
    s = jnp.where(m_ref[0] != 0, s, -1e10)  # masked_fill(mask == 0, -1e10)

    # Numerically stable softmax (invariant to the max subtraction).
    s_max = jnp.max(s, axis=-1, keepdims=True)
    e = jnp.exp(s - s_max)
    denom = jnp.sum(e, axis=-1, keepdims=True)
    alpha = e / denom
    alpha_ref[0] = alpha.astype(alpha_ref.dtype)

    # TODO(synk): dropout on alpha is identity in eval mode; add pltpu.prng_*
    # Bernoulli masking here if training-mode dropout is ever required.
    ctx = jnp.dot(alpha, v, preferred_element_type=jnp.float32)
    ctx_ref[0] = ctx.astype(ctx_ref.dtype)


def attention_core(q, k, v, mask, *, scale):
    """q/k/v: (B*H, S, Dh). mask: (B*H, Sq, Sk) int32 -> (ctx, alpha)."""
    BH, Sq, Dh = q.shape
    Sk = k.shape[1]
    kern = functools.partial(attn_kernel, scale=scale)
    ctx, alpha = pl.pallas_call(
        kern,
        out_shape=(
            jax.ShapeDtypeStruct((BH, Sq, Dh), q.dtype),
            jax.ShapeDtypeStruct((BH, Sq, Sk), jnp.float32),
        ),
        grid_spec=pltpu.PrefetchScalarGridSpec(
            num_scalar_prefetch=0,
            grid=(BH,),
            in_specs=[
                pl.BlockSpec((1, Sq, Dh), lambda i: (i, 0, 0)),
                pl.BlockSpec((1, Sk, Dh), lambda i: (i, 0, 0)),
                pl.BlockSpec((1, Sk, Dh), lambda i: (i, 0, 0)),
                pl.BlockSpec((1, Sq, Sk), lambda i: (i, 0, 0)),
            ],
            out_specs=[
                pl.BlockSpec((1, Sq, Dh), lambda i: (i, 0, 0)),
                pl.BlockSpec((1, Sq, Sk), lambda i: (i, 0, 0)),
            ],
        ),
        compiler_params=pltpu.CompilerParams(
            dimension_semantics=("parallel",)),
    )(q, k, v, mask)
    return ctx, alpha


# ---------------------------------------------------------------------------
# Full module forward
# ---------------------------------------------------------------------------
def multi_head_attention(query, key, value, mask, params, *, n_heads):
    """query/key/value: (B, S, hid). mask: None or broadcastable to
    (B, n_heads, Sq, Sk). Returns (out (B, Sq, hid), alpha (B, n_heads, Sq, Sk))."""
    wq, bq, wk, bk, wv, bv, wo, bo = params
    B, Sq, hid = query.shape
    Sk = key.shape[1]
    Dh = hid // n_heads
    scale = 1.0 / math.sqrt(Dh)

    if query is key and key is value:
        # Self-attention: fuse the three projections into one lane-dense matmul.
        w_qkv = jnp.concatenate([wq, wk, wv], axis=1)
        b_qkv = jnp.concatenate([bq, bk, bv], axis=0)
        qkv = linear(query.reshape(B * Sq, hid), w_qkv, b_qkv)
        Q, K, V = jnp.split(qkv, 3, axis=1)
    else:
        Q = linear(query.reshape(B * Sq, hid), wq, bq)
        K = linear(key.reshape(B * Sk, hid), wk, bk)
        V = linear(value.reshape(B * Sk, hid), wv, bv)

    # (B, S, hid) -> (B, H, S, Dh) -> (B*H, S, Dh)
    Qh = Q.reshape(B, Sq, n_heads, Dh).transpose(0, 2, 1, 3).reshape(B * n_heads, Sq, Dh)
    Kh = K.reshape(B, Sk, n_heads, Dh).transpose(0, 2, 1, 3).reshape(B * n_heads, Sk, Dh)
    Vh = V.reshape(B, Sk, n_heads, Dh).transpose(0, 2, 1, 3).reshape(B * n_heads, Sk, Dh)

    if mask is None:
        mask_b = jnp.ones((B, n_heads, Sq, Sk), jnp.int32)
    else:
        mask_b = jnp.broadcast_to(mask, (B, n_heads, Sq, Sk)).astype(jnp.int32)
    mask_b = mask_b.reshape(B * n_heads, Sq, Sk)

    ctx, alpha = attention_core(Qh, Kh, Vh, mask_b, scale=scale)

    # (B*H, Sq, Dh) -> (B, Sq, hid), then output projection.
    ctx = ctx.reshape(B, n_heads, Sq, Dh).transpose(0, 2, 1, 3).reshape(B * Sq, hid)
    out = linear(ctx, wo, bo).reshape(B, Sq, hid)
    alpha = alpha.reshape(B, n_heads, Sq, Sk)
    return out, alpha


def init_params(key, hid_dim, dtype=jnp.float32):
    """Deterministic init matching nn.Linear U(-1/sqrt(fan_in), 1/sqrt(fan_in)).
    Weights stored pre-transposed to (in, out)."""
    ks = jax.random.split(key, 8)
    lim = 1.0 / math.sqrt(hid_dim)

    def lin(kw, kb):
        w = jax.random.uniform(kw, (hid_dim, hid_dim), dtype, -lim, lim)
        b = jax.random.uniform(kb, (hid_dim,), dtype, -lim, lim)
        return w, b

    wq, bq = lin(ks[0], ks[1])
    wk, bk = lin(ks[2], ks[3])
    wv, bv = lin(ks[4], ks[5])
    wo, bo = lin(ks[6], ks[7])
    return (wq, bq, wk, bk, wv, bv, wo, bo)


def ref_mha(query, key_, value, mask, params, n_heads):
    """Pure-JAX reference matching the PyTorch forward."""
    wq, bq, wk, bk, wv, bv, wo, bo = params
    B, Sq, hid = query.shape
    Sk = key_.shape[1]
    Dh = hid // n_heads
    Q = query @ wq + bq
    K = key_ @ wk + bk
    V = value @ wv + bv
    Qh = Q.reshape(B, Sq, n_heads, Dh).transpose(0, 2, 1, 3)
    Kh = K.reshape(B, Sk, n_heads, Dh).transpose(0, 2, 1, 3)
    Vh = V.reshape(B, Sk, n_heads, Dh).transpose(0, 2, 1, 3)
    score = jnp.einsum("bhqd,bhkd->bhqk", Qh, Kh) / math.sqrt(Dh)
    if mask is not None:
        score = jnp.where(jnp.broadcast_to(mask, score.shape) == 0, -1e10, score)
    alpha = jax.nn.softmax(score, axis=-1)
    x = jnp.einsum("bhqk,bhkd->bhqd", alpha, Vh)
    x = x.transpose(0, 2, 1, 3).reshape(B, Sq, hid)
    out = x @ wo + bo
    return out, alpha


if __name__ == "__main__":
    batch, seq, hid_dim, n_heads = 2, 8, 32, 4

    key = jax.random.PRNGKey(0)
    kx, kp = jax.random.split(key)
    x = jax.random.normal(kx, (batch, seq, hid_dim), jnp.float32)
    params = init_params(kp, hid_dim)

    # Decoder-style causal mask, shape (B, 1, S, S); positions with mask==0 are blocked.
    causal = jnp.tril(jnp.ones((seq, seq), jnp.int32))[None, None]
    mask = jnp.broadcast_to(causal, (batch, 1, seq, seq))

    out, alpha = multi_head_attention(x, x, x, mask, params, n_heads=n_heads)
    out = jax.block_until_ready(out)
    alpha = jax.block_until_ready(alpha)

    ref_out, ref_alpha = ref_mha(x, x, x, mask, params, n_heads)
    assert out.shape == (batch, seq, hid_dim)
    assert alpha.shape == (batch, n_heads, seq, seq)
    assert jnp.allclose(out, ref_out, atol=1e-3, rtol=1e-3)
    assert jnp.allclose(alpha, ref_alpha, atol=1e-3, rtol=1e-3)

    print("KERNEL_OK")
</pallas_src>

<mosaic_0001>
module attributes {stable_mosaic.version = 11 : i64} {
  func.func @linear_kernel(%arg0: i32, %arg1: memref<16x32xf32, #tpu.memory_space<vmem>>, %arg2: memref<32x96xf32, #tpu.memory_space<vmem>>, %arg3: memref<1x96xf32, #tpu.memory_space<vmem>>, %arg4: memref<16x96xf32, #tpu.memory_space<vmem>>) attributes {dimension_semantics = [#tpu.dimension_semantics<parallel>], iteration_bounds = array<i64: 1>, scalar_prefetch = 0 : i64, scratch_operands = 0 : i64, tpu.core_type = #tpu.core_type<tc>, window_params = [{transform_indices = @transform_0, window_bounds = array<i64: 16, 32>}, {pipeline_mode = #tpu.pipeline_mode<synchronous>, transform_indices = @transform_1, window_bounds = array<i64: 32, 96>}, {pipeline_mode = #tpu.pipeline_mode<synchronous>, transform_indices = @transform_2, window_bounds = array<i64: 1, 96>}, {transform_indices = @transform_3, window_bounds = array<i64: 16, 96>}]} {
    %c0 = arith.constant 0 : index
    %c0_0 = arith.constant 0 : index
    %0 = vector.load %arg1[%c0, %c0_0] : memref<16x32xf32, #tpu.memory_space<vmem>>, vector<16x32xf32>
    %c0_1 = arith.constant 0 : index
    %c0_2 = arith.constant 0 : index
    %1 = vector.load %arg2[%c0_1, %c0_2] : memref<32x96xf32, #tpu.memory_space<vmem>>, vector<32x96xf32>
    %cst = arith.constant dense<0.000000e+00> : vector<16x96xf32>
    %2 = tpu.matmul %0, %1, %cst {dimension_numbers = #tpu.dot_dimension_numbers<[1], [0], [0], [1], [0, 0, 1, 1], [], []>} : vector<16x32xf32>, vector<32x96xf32>, vector<16x96xf32> -> vector<16x96xf32>
    %c0_3 = arith.constant 0 : index
    %c0_4 = arith.constant 0 : index
    %3 = vector.load %arg3[%c0_3, %c0_4] : memref<1x96xf32, #tpu.memory_space<vmem>>, vector<1x96xf32>
    %4 = vector.broadcast %3 : vector<1x96xf32> to vector<16x96xf32>
    %5 = arith.addf %2, %4 : vector<16x96xf32>
    %c0_5 = arith.constant 0 : index
    %c0_6 = arith.constant 0 : index
    %6 = vector.load %arg4[%c0_5, %c0_6] : memref<16x96xf32, #tpu.memory_space<vmem>>, vector<16x96xf32>
    tpu.vector_store %arg4[%c0_5, %c0_6], %5 {strides = array<i32>} : memref<16x96xf32, #tpu.memory_space<vmem>>, vector<16x96xf32>,
    return
  }
  func.func @transform_0(%arg0: i32) -> (i32, i32) {
    %c0_i32 = arith.constant 0 : i32
    %c0_i32_0 = arith.constant 0 : i32
    return %arg0, %c0_i32 : i32, i32
  }
  func.func @transform_1(%arg0: i32) -> (i32, i32) {
    %c0_i32 = arith.constant 0 : i32
    %c0_i32_0 = arith.constant 0 : i32
    %c0_i32_1 = arith.constant 0 : i32
    return %c0_i32, %c0_i32_0 : i32, i32
  }
  func.func @transform_2(%arg0: i32) -> (i32, i32) {
    %c0_i32 = arith.constant 0 : i32
    %c0_i32_0 = arith.constant 0 : i32
    %c0_i32_1 = arith.constant 0 : i32
    return %c0_i32, %c0_i32_0 : i32, i32
  }
  func.func @transform_3(%arg0: i32) -> (i32, i32) {
    %c0_i32 = arith.constant 0 : i32
    %c0_i32_0 = arith.constant 0 : i32
    return %arg0, %c0_i32 : i32, i32
  }
}

</mosaic_0001>

<bundles_post_ra>
// kernel: tpu_custom_call.1
= control target key start
LH: loop header
LB: loop body
LE: loop exit
PB: predicated region body
PF: predicated region fallthrough
CT: control target
= control target key end

     0   :  { %8 = vsyncpa [#allocation3], 0  ;;  %s298_s0 = inlined_call_operand.hbm [shape: f32[16,32], index: 0, kind: input, shape index: {}]   ;;  %s299_s1 = inlined_call_operand.hbm [shape: f32[32,96], index: 1, kind: input, shape index: {}]   ;;  %s300_s2 = inlined_call_operand.vmem [shape: f32[1,96], index: 2, kind: input, shape index: {}]   ;;  %s301_s3 = inlined_call_operand.hbm [shape: f32[16,96], index: 3, kind: output, shape index: {}]  }
   0x1   :  { %9 = vsyncpa [#allocation6], 0 }
   0x2   :  { %10 = vsyncpa [#allocation4], 0  ;;  %s250_s12 = smov [#allocation2]  }
   0x3   :  { %s16_s13 = sshll.u32 %s250_s12, 4  ;;  %s17_s13 = int_to_ptr.vmem [resolvable:$true] %s16_s13 }
   0x4   :  { %s192_s14 = scalar_lea.vmem %s17_s13, 256  ;;  %p197_p1 = scmp.lt.s32.totalorder %s17_s13, %s17_s13 }
   0x5   :  { %p193_p0 = scmp.ne.s32.totalorder %s17_s13, %s192_s14  ;;  %p198_p2 = scmp.lt.s32.totalorder %s192_s14, %s192_s14 }
   0x7   :  { %p199_p3 = por %p198_p2, %p197_p1 }
   0x9   :  { %p200_p4 = pnand %p199_p3, %p193_p0 }
   0xb   :  { %203 = shalt.err (!%p200_p4)
}
   0xc   :  { %s251_s15 = smov 128   ;;  %s252_s16 = smov 8  }
   0xd   :  { %22 = dma.hbm_to_vmem [thread:$0]  %s298_s0, 256, %s17_s13, [#allocation3], %s251_s15, %s251_s15, %s252_s16  }
   0xe   :  { %s253_s19 = smov [#allocation5]  }
   0xf   :  { %s28_s20 = sshll.u32 %s253_s19, 4  ;;  %s29_s20 = int_to_ptr.vmem [resolvable:$true] %s28_s20 }
  0x10   :  { %s212_s21 = scalar_lea.vmem %s29_s20, 512  ;;  %p217_p6 = scmp.lt.s32.totalorder %s29_s20, %s29_s20 }
  0x11   :  { %p213_p5 = scmp.ne.s32.totalorder %s29_s20, %s212_s21  ;;  %p218_p7 = scmp.lt.s32.totalorder %s212_s21, %s212_s21 }
  0x13   :  { %p219_p8 = por %p218_p7, %p217_p6 }
  0x15   :  { %p220_p9 = pnand %p219_p8, %p213_p5 }
  0x17   :  { %223 = shalt.err (!%p220_p9)
}
  0x18   :  { %34 = dma.hbm_to_vmem [thread:$0]  %s299_s1, 512, %s29_s20, [#allocation6], %s251_s15, %s251_s15, %s252_s16  }
  0x19   :  { %244 = dma.done.wait [#allocation3], 256  }
  0x1a   :  { %245 = vsyncadd [#allocation3], 4294967040 }
  0x1b   :  { %246 = dma.done.wait [#allocation6], 512  }
  0x1c   :  { %247 = vsyncadd [#allocation6], 4294966784  ;;  %vm56_vm0 = vcmask 261120   ;;  %v48_v0 = vld [vmem:[#allocation5 + $0x18] sm:$0xff]  ;;  %v47_v1 = vld [vmem:[#allocation5 + $0x10] sm:$0xff]  ;;  %vm138_vm1 = vcmask 785408  }
  0x1d   :  { %168 = vmatprep.subr.mxu0 %v48_v0  ;;  %v43_v2 = vld [vmem:[#allocation2] sm:$0xff]  ;;  %v46_v3 = vld [vmem:[#allocation5 + $0x8] sm:$0xff]  ;;  %v45_v4 = vld [vmem:[#allocation5] sm:$0xff]  ;;  %s254_s24 = smov [#allocation7]  }
  0x1e   :  { %169 = vmatpush3.msra.mxu0 %v48_v0  ;;  %176 = vmatprep.mubr.msk.f32.mxu0 %vm56_vm0, %v43_v2  ;;  %v44_v5 = vld [vmem:[#allocation2 + $0x8] sm:$0xff]  ;;  %v159_v6 = vld [vmem:[%s300_s2] ss:$0 sm:$0xff]  ;;  %s146_s25 = sshll.u32 %s254_s24, 4  ;;  %s147_s25 = int_to_ptr.vmem [resolvable:$true] %s146_s25 }
  0x1f   :  { %170 = vmatprep.subr.mxu0 %v47_v1  ;;  %s224_s26 = scalar_lea.vmem %s147_s25, 256  ;;  %p229_p11 = scmp.lt.s32.totalorder %s147_s25, %s147_s25 }
  0x20   :  { %171 = vmatpush3.msra.mxu0 %v47_v1  ;;  %p225_p10 = scmp.ne.s32.totalorder %s147_s25, %s224_s26  ;;  %p230_p12 = scmp.lt.s32.totalorder %s224_s26, %s224_s26 }
  0x21   :  { %172 = vmatprep.subr.mxu0 %v46_v3 }
  0x22   :  { %173 = vmatpush3.msra.mxu0 %v46_v3  ;;  %p231_p13 = por %p230_p12, %p229_p11 }
  0x23   :  { %174 = vmatprep.subr.mxu0 %v45_v4 }
  0x24   :  { %175 = vmatpush3.msra.mxu0 %v45_v4  ;;  %p232_p0 = pnand %p231_p13, %p225_p10 }
  0x25   :  { %177 = vmatmul.mubr.msk.f32.vlgmr.msra.gmra.mxu0 %vm56_vm0, %v44_v5 }
  0xe5   :  { %v178_v7 = vpop.f32.mrf.mxu0 }
  0xe6   :  { %v135_v8 = vadd.f32 %v178_v7, %v159_v6 }
  0xe7   :  { %v129_v9 = vpop.f32.mrf.mxu0 }
  0xe8   :  { %v130_v10 = vadd.f32 %v159_v6, %v129_v9  ;;  %140 = vst.msk [vmem:[#allocation7 + $0x8] sm:$0xff] %vm138_vm1, %v135_v8 }
  0xea   :  { %139 = vst.msk [vmem:[#allocation7] sm:$0xff] %vm138_vm1, %v130_v10 }
  0xeb   :  { %235 = shalt.err (!%p232_p0)
}
  0xec   :  { %152 = dma.vmem_to_hbm [thread:$0]  %s147_s25, 256, %s301_s3, [#allocation4], %s251_s15, %s251_s15, %s252_s16  }
  0xed   :  { %248 = dma.done.wait [#allocation4], 256  }
  0xee   :  { %249 = vsyncadd [#allocation4], 4294967040 }
  0xef   :  { %156 = vsyncpa [#allocation3], 1 }
  0xf0   :  { %157 = vsyncpa [#allocation6], 1 }
  0xf1   :  { %158 = vsyncpa [#allocation4], 1 }

</bundles_post_ra>
